<compile_context>
chip_gen: v6e
topology: v6e:2x2x1
jax: 0.10.0
libtpu: 0.0.40
codegen_flags: <defaults>
</compile_context>

<pallas_src>
import functools

import jax
import jax.numpy as jnp
from jax import lax
from jax.experimental import pallas as pl
from jax.experimental.pallas import tpu as pltpu


def _round_up(x, m):
    return (x + m - 1) // m * m


def _sep_word_embed_kernel(idx_ref, table_ref, out_ref, *, offsets):
    # idx_ref  : (tile_n, 3)    int32   row tile of attribute indices
    # table_ref: (Vp, OUTp)     float32 fused block-diagonal embedding table
    # out_ref  : (tile_n, OUTp) float32 concatenated embeddings (lane-dense)
    idx = idx_ref[...]
    tile_n = idx.shape[0]
    vp = table_ref.shape[0]
    iota = lax.broadcasted_iota(jnp.int32, (tile_n, vp), 1)
    # Multi-hot selector: each attribute hits exactly one row of its own
    # (disjoint) range in the fused table, so the sum of the three one-hots
    # selects all three embeddings in a single matmul.
    mh = jnp.zeros((tile_n, vp), jnp.float32)
    for a, off in enumerate(offsets):           # offsets are static Python ints
        mh = mh + (iota == (idx[:, a:a + 1] + off)).astype(jnp.float32)
    # One MXU matmul -> one full-width lane-dense store (no per-attribute
    # partial stores, no redundant astype: dtypes already match).
    out_ref[...] = jnp.dot(mh, table_ref[...], preferred_element_type=jnp.float32)


def sep_word_embed(attr_seq_tsr, table1, table2, table3, *,
                   tile_n=1024, vmem_limit_bytes=None):
    """attr_seq_tsr: (B, S, 3) int; table_k: (V_k, E) float32.

    Returns (B, S, 3*E) float32 == concat([emb1, emb2, emb3], axis=-1),
    matching the PyTorch SepWordEmbed forward.

    tile_n: rows per grid step. ~1024-2048 on v7x (64 MiB VMEM), up to 4096 on
    v5e/v6e if vmem_limit_bytes is raised.
    """
    B, S, three = attr_seq_tsr.shape
    assert three == 3
    E = table1.shape[1]
    assert table2.shape[1] == E and table3.shape[1] == E
    v1, v2, v3 = table1.shape[0], table2.shape[0], table3.shape[0]
    vtot = v1 + v2 + v3
    vp = _round_up(vtot, 8)            # sublane-align the fused-table K dim
    out_w = 3 * E
    out_wp = _round_up(out_w, 128)     # lane-dense output width

    # Fused block-diagonal table (tiny: vp x out_wp), built once per call.
    def _place(t, r0, c0):
        return jnp.pad(t.astype(jnp.float32),
                       ((r0, vp - r0 - t.shape[0]),
                        (c0, out_wp - c0 - t.shape[1])))
    fused_table = (_place(table1, 0, 0)
                   + _place(table2, v1, E)
                   + _place(table3, v1 + v2, 2 * E))
    offsets = (0, v1, v1 + v2)         # static per-attribute row offsets

    N = B * S
    idx_flat = attr_seq_tsr.reshape(N, 3).astype(jnp.int32)

    tile_n = max(8, _round_up(tile_n, 8))
    rows_blk = N if N <= tile_n else tile_n
    grid = (pl.cdiv(N, rows_blk),)     # partial last block clipped by Pallas

    out = pl.pallas_call(
        functools.partial(_sep_word_embed_kernel, offsets=offsets),
        out_shape=jax.ShapeDtypeStruct((N, out_wp), jnp.float32),
        grid_spec=pltpu.PrefetchScalarGridSpec(
            num_scalar_prefetch=0,
            grid=grid,
            in_specs=[
                pl.BlockSpec((rows_blk, 3), lambda i: (i, 0)),   # index tile
                # Fused table is grid-invariant (constant index_map); it is
                # ~100 KB so default double-buffering is negligible VMEM.
                pl.BlockSpec((vp, out_wp), lambda i: (0, 0)),
            ],
            out_specs=pl.BlockSpec((rows_blk, out_wp), lambda i: (i, 0)),
        ),
        compiler_params=pltpu.CompilerParams(
            dimension_semantics=("parallel",),
            vmem_limit_bytes=vmem_limit_bytes,
        ),
    )(idx_flat, fused_table)

    if out_wp != out_w:                # only for small-E demos; E=256 path is a no-op
        out = out[:, :out_w]
    return out.reshape(B, S, out_w)


def _reference(attr_seq_tsr, t1, t2, t3):
    return jnp.concatenate(
        [t1[attr_seq_tsr[..., 0]],
         t2[attr_seq_tsr[..., 1]],
         t3[attr_seq_tsr[..., 2]]], axis=-1)


def _make_case(key, embed_dims, embed_size, B, S):
    k1, k2, k3, ki = jax.random.split(key, 4)
    t1 = jax.random.normal(k1, (embed_dims[0] + 1, embed_size), jnp.float32)
    t2 = jax.random.normal(k2, (embed_dims[1] + 1, embed_size), jnp.float32)
    t3 = jax.random.normal(k3, (embed_dims[2] + 1, embed_size), jnp.float32)
    ki1, ki2, ki3 = jax.random.split(ki, 3)
    idx = jnp.stack([
        jax.random.randint(ki1, (B, S), 0, embed_dims[0] + 1, jnp.int32),
        jax.random.randint(ki2, (B, S), 0, embed_dims[1] + 1, jnp.int32),
        jax.random.randint(ki3, (B, S), 0, embed_dims[2] + 1, jnp.int32),
    ], axis=-1)
    return idx, t1, t2, t3


def main():
    key = jax.random.PRNGKey(0)
    k_a, k_b = jax.random.split(key)

    # Case 1: small demo shapes (single-block path; 3E=96 padded to 128 lanes).
    idx, t1, t2, t3 = _make_case(k_a, (7, 10, 10), 32, 2, 8)
    out = jax.block_until_ready(sep_word_embed(idx, t1, t2, t3))
    ref = _reference(idx, t1, t2, t3)
    assert out.shape == ref.shape, (out.shape, ref.shape)
    assert jnp.allclose(out, ref, atol=1e-5, rtol=1e-5), "case 1 mismatch"

    # Case 2: module-default embed_size=256 (3E=768, lane-dense fast path) with
    # a multi-step grid and a partial last row tile (N=400, tile_n=128).
    idx, t1, t2, t3 = _make_case(k_b, (7, 10, 10), 256, 4, 100)
    out = jax.block_until_ready(sep_word_embed(idx, t1, t2, t3, tile_n=128))
    ref = _reference(idx, t1, t2, t3)
    assert out.shape == ref.shape, (out.shape, ref.shape)
    assert jnp.allclose(out, ref, atol=1e-5, rtol=1e-5), "case 2 mismatch"

    print("KERNEL_OK")


if __name__ == "__main__":
    main()
</pallas_src>

<mosaic_0001>
module attributes {stable_mosaic.version = 11 : i64} {
  func.func @_sep_word_embed_kernel(%arg0: i32, %arg1: memref<16x3xi32, #tpu.memory_space<vmem>>, %arg2: memref<32x128xf32, #tpu.memory_space<vmem>>, %arg3: memref<16x128xf32, #tpu.memory_space<vmem>>) attributes {dimension_semantics = [#tpu.dimension_semantics<parallel>], iteration_bounds = array<i64: 1>, scalar_prefetch = 0 : i64, scratch_operands = 0 : i64, tpu.core_type = #tpu.core_type<tc>, window_params = [{transform_indices = @transform_0, window_bounds = array<i64: 16, 3>}, {pipeline_mode = #tpu.pipeline_mode<synchronous>, transform_indices = @transform_1, window_bounds = array<i64: 32, 128>}, {transform_indices = @transform_2, window_bounds = array<i64: 16, 128>}]} {
    %c0 = arith.constant 0 : index
    %c0_0 = arith.constant 0 : index
    %0 = vector.load %arg1[%c0, %c0_0] : memref<16x3xi32, #tpu.memory_space<vmem>>, vector<16x3xi32>
    %1 = tpu.iota {dimensions = array<i32: 1>} : vector<16x32xi32>
    %cst = arith.constant 0.000000e+00 : f32
    %2 = vector.broadcast %cst : f32 to vector<16x32xf32>
    %3 = vector.extract_strided_slice %0 {offsets = [0, 0], sizes = [16, 1], strides = [1, 1]} : vector<16x3xi32> to vector<16x1xi32>
    %c0_i32 = arith.constant 0 : i32
    %4 = vector.broadcast %c0_i32 : i32 to vector<16x1xi32>
    %5 = arith.addi %3, %4 : vector<16x1xi32>
    %6 = vector.broadcast %5 : vector<16x1xi32> to vector<16x32xi32>
    %7 = arith.cmpi eq, %1, %6 : vector<16x32xi32>
    %8 = arith.extui %7 : vector<16x32xi1> to vector<16x32xi32>
    %9 = arith.sitofp %8 : vector<16x32xi32> to vector<16x32xf32>
    %10 = arith.addf %2, %9 : vector<16x32xf32>
    %11 = vector.extract_strided_slice %0 {offsets = [0, 1], sizes = [16, 1], strides = [1, 1]} : vector<16x3xi32> to vector<16x1xi32>
    %c8_i32 = arith.constant 8 : i32
    %12 = vector.broadcast %c8_i32 : i32 to vector<16x1xi32>
    %13 = arith.addi %11, %12 : vector<16x1xi32>
    %14 = vector.broadcast %13 : vector<16x1xi32> to vector<16x32xi32>
    %15 = arith.cmpi eq, %1, %14 : vector<16x32xi32>
    %16 = arith.extui %15 : vector<16x32xi1> to vector<16x32xi32>
    %17 = arith.sitofp %16 : vector<16x32xi32> to vector<16x32xf32>
    %18 = arith.addf %10, %17 : vector<16x32xf32>
    %19 = vector.extract_strided_slice %0 {offsets = [0, 2], sizes = [16, 1], strides = [1, 1]} : vector<16x3xi32> to vector<16x1xi32>
    %c19_i32 = arith.constant 19 : i32
    %20 = vector.broadcast %c19_i32 : i32 to vector<16x1xi32>
    %21 = arith.addi %19, %20 : vector<16x1xi32>
    %22 = vector.broadcast %21 : vector<16x1xi32> to vector<16x32xi32>
    %23 = arith.cmpi eq, %1, %22 : vector<16x32xi32>
    %24 = arith.extui %23 : vector<16x32xi1> to vector<16x32xi32>
    %25 = arith.sitofp %24 : vector<16x32xi32> to vector<16x32xf32>
    %26 = arith.addf %18, %25 : vector<16x32xf32>
    %c0_1 = arith.constant 0 : index
    %c0_2 = arith.constant 0 : index
    %27 = vector.load %arg2[%c0_1, %c0_2] : memref<32x128xf32, #tpu.memory_space<vmem>>, vector<32x128xf32>
    %cst_3 = arith.constant dense<0.000000e+00> : vector<16x128xf32>
    %28 = tpu.matmul %26, %27, %cst_3 {dimension_numbers = #tpu.dot_dimension_numbers<[1], [0], [0], [1], [0, 0, 1, 1], [], []>} : vector<16x32xf32>, vector<32x128xf32>, vector<16x128xf32> -> vector<16x128xf32>
    %c0_4 = arith.constant 0 : index
    %c0_5 = arith.constant 0 : index
    %29 = vector.load %arg3[%c0_4, %c0_5] : memref<16x128xf32, #tpu.memory_space<vmem>>, vector<16x128xf32>
    tpu.vector_store %arg3[%c0_4, %c0_5], %28 {strides = array<i32>} : memref<16x128xf32, #tpu.memory_space<vmem>>, vector<16x128xf32>,
    return
  }
  func.func @transform_0(%arg0: i32) -> (i32, i32) {
    %c0_i32 = arith.constant 0 : i32
    %c0_i32_0 = arith.constant 0 : i32
    return %arg0, %c0_i32 : i32, i32
  }
  func.func @transform_1(%arg0: i32) -> (i32, i32) {
    %c0_i32 = arith.constant 0 : i32
    %c0_i32_0 = arith.constant 0 : i32
    %c0_i32_1 = arith.constant 0 : i32
    return %c0_i32, %c0_i32_0 : i32, i32
  }
  func.func @transform_2(%arg0: i32) -> (i32, i32) {
    %c0_i32 = arith.constant 0 : i32
    %c0_i32_0 = arith.constant 0 : i32
    return %arg0, %c0_i32 : i32, i32
  }
}

</mosaic_0001>

<bundles_post_ra>
// kernel: tpu_custom_call.1
= control target key start
LH: loop header
LB: loop body
LE: loop exit
PB: predicated region body
PF: predicated region fallthrough
CT: control target
= control target key end

     0   :  { %7 = vsyncpa [#allocation3], 0  ;;  %s305_s0 = inlined_call_operand.vmem [shape: s32[16,3], index: 0, kind: input, shape index: {}]   ;;  %s306_s1 = inlined_call_operand.hbm [shape: f32[32,128], index: 1, kind: input, shape index: {}]   ;;  %s307_s2 = inlined_call_operand.hbm [shape: f32[16,128], index: 2, kind: output, shape index: {}]  }
   0x1   :  { %8 = vsyncpa [#allocation4], 0  ;;  %s264_s9 = smov [#allocation2]  }
   0x2   :  { %s16_s10 = sshll.u32 %s264_s9, 4  ;;  %s17_s10 = int_to_ptr.vmem [resolvable:$true] %s16_s10 }
   0x3   :  { %s228_s11 = scalar_lea.vmem %s17_s10, 512  ;;  %p233_p1 = scmp.lt.s32.totalorder %s17_s10, %s17_s10 }
   0x4   :  { %p229_p0 = scmp.ne.s32.totalorder %s17_s10, %s228_s11  ;;  %p234_p2 = scmp.lt.s32.totalorder %s228_s11, %s228_s11 }
   0x6   :  { %p235_p3 = por %p234_p2, %p233_p1 }
   0x8   :  { %p236_p4 = pnand %p235_p3, %p229_p0 }
   0xa   :  { %239 = shalt.err (!%p236_p4)
}
   0xb   :  { %s265_s12 = smov 128   ;;  %s266_s13 = smov 8  }
   0xc   :  { %22 = dma.hbm_to_vmem [thread:$0]  %s306_s1, 512, %s17_s10, [#allocation3], %s265_s12, %s265_s12, %s266_s13  }
   0xd   :  { %260 = dma.done.wait [#allocation3], 512  }
   0xe   :  { %261 = vsyncadd [#allocation3], 4294966784  ;;  %v267_v0 = vmov 0   ;;  %v27_v1 = vld [vmem:[%s305_s0 + $0x8] sm:$0xff]  ;;  %v26_v2 = vld [vmem:[%s305_s0] sm:$0xff]  ;;  %v268_v6 = vmov 1   ;;  %v28_v13 = vlaneseq }
   0xf   :  { %215 = vset.pattern.permute.xlu1 %v267_v0  ;;  %214 = vset.pattern.permute.xlu0 %v267_v0  ;;  %v45_v3 = vadd.s32 8, %v27_v1  ;;  %v44_v4 = vadd.s32 8, %v26_v2  ;;  %v79_v5 = vld [vmem:[#allocation2 + $0x18] sm:$0xff]  ;;  %v78_v7 = vld [vmem:[#allocation2 + $0x10] sm:$0xff]  ;;  %v60_v8 = vadd.s32 19, %v26_v2  ;;  %v61_v9 = vadd.s32 19, %v27_v1 }
  0x10   :  { %34 = vperm.xlu1 %215, %v27_v1   ;;  %31 = vperm.xlu0 %214, %v26_v2   ;;  %v77_v10 = vld [vmem:[#allocation2 + $0x8] sm:$0xff]  ;;  %v269_v11 = vmov 2   ;;  %v76_v12 = vld [vmem:[#allocation2] sm:$0xff]  ;;  %v29_v16 = vand.u32 127, %v28_v13  ;;  %v270_v19 = vmov 0.0   ;;  %vm80_vm6 = vcmask 261120  }
  0x11   :  { %195 = vmatprep.subr.mxu0 %v79_v5  ;;  %s271_s0 = smov [#allocation5]  }
  0x12   :  { %196 = vmatpush3.msra.mxu0 %v79_v5  ;;  %s169_s1 = sshll.u32 %s271_s0, 4  ;;  %s170_s1 = int_to_ptr.vmem [resolvable:$true] %s169_s1 }
  0x13   :  { %197 = vmatprep.subr.mxu0 %v78_v7  ;;  %s240_s20 = scalar_lea.vmem %s170_s1, 256  ;;  %p245_p6 = scmp.lt.s32.totalorder %s170_s1, %s170_s1 }
  0x14   :  { %217 = vset.pattern.permute.xlu1 %v268_v6  ;;  %216 = vset.pattern.permute.xlu0 %v268_v6  ;;  %p241_p5 = scmp.ne.s32.totalorder %s170_s1, %s240_s20  ;;  %p246_p7 = scmp.lt.s32.totalorder %s240_s20, %s240_s20 }
  0x15   :  { %50 = vperm.xlu1 %217, %v45_v3   ;;  %47 = vperm.xlu0 %216, %v44_v4  }
  0x16   :  { %198 = vmatpush3.msra.mxu0 %v78_v7  ;;  %p247_p8 = por %p246_p7, %p245_p6 }
  0x17   :  { %199 = vmatprep.subr.mxu0 %v77_v10 }
  0x18   :  { %200 = vmatpush3.msra.mxu0 %v77_v10  ;;  %p248_p9 = pnand %p247_p8, %p241_p5 }
  0x19   :  { %218 = vset.pattern.permute.xlu1 %v269_v11  ;;  %219 = vset.pattern.permute.xlu0 %v269_v11 }
  0x1a   :  { %63 = vperm.xlu1 %218, %v60_v8   ;;  %66 = vperm.xlu0 %219, %v61_v9  }
  0x1b   :  { %201 = vmatprep.subr.mxu0 %v76_v12 }
  0x1c   :  { %202 = vmatpush3.msra.mxu0 %v76_v12 }
  0x8b   :  { %v35_v14 = vpop.permute.xlu1 %34  ;;  %v32_v15 = vpop.permute.xlu0 %31 }
  0x8c   :  { %vm37_vm2 = vcmp.eq.s32.totalorder %v29_v16, %v35_v14  ;;  %vm36_vm3 = vcmp.eq.s32.totalorder %v29_v16, %v32_v15 }
  0x8d   :  { %v182_v22 = vsel %vm37_vm2, 1.0, %v270_v19  ;;  %v181_v23 = vsel %vm36_vm3, 1.0, %v270_v19 }
  0x90   :  { %v51_v17 = vpop.permute.xlu1 %50  ;;  %v48_v18 = vpop.permute.xlu0 %47 }
  0x91   :  { %vm53_vm0 = vcmp.eq.s32.totalorder %v29_v16, %v51_v17  ;;  %vm52_vm1 = vcmp.eq.s32.totalorder %v29_v16, %v48_v18 }
  0x92   :  { %v184_v20 = vsel %vm53_vm0, 1.0, %v270_v19  ;;  %v183_v21 = vsel %vm52_vm1, 1.0, %v270_v19 }
  0x93   :  { %v59_v26 = vadd.f32 %v184_v20, %v182_v22  ;;  %v58_v27 = vadd.f32 %v183_v21, %v181_v23 }
  0x95   :  { %v64_v24 = vpop.permute.xlu1 %63  ;;  %v67_v25 = vpop.permute.xlu0 %66 }
  0x96   :  { %vm68_vm4 = vcmp.eq.s32.totalorder %v29_v16, %v64_v24  ;;  %vm69_vm5 = vcmp.eq.s32.totalorder %v29_v16, %v67_v25 }
  0x97   :  { %v185_v28 = vsel %vm68_vm4, 1.0, %v270_v19  ;;  %v186_v29 = vsel %vm69_vm5, 1.0, %v270_v19 }
  0x98   :  { %v75_v30 = vadd.f32 %v186_v29, %v59_v26  ;;  %v74_v31 = vadd.f32 %v185_v28, %v58_v27 }
  0x9a   :  { %203 = vmatprep.mubr.msk.f32.mxu0 %vm80_vm6, %v74_v31 }
  0x9b   :  { %204 = vmatmul.mubr.msk.f32.vlgmr.msra.gmra.mxu0 %vm80_vm6, %v75_v30 }
 0x15b   :  { %v205_v32 = vpop.f32.mrf.mxu0 }
 0x15c   :  { %163 = vst [vmem:[#allocation5 + $0x8] sm:$0xff] %v205_v32 }
 0x15d   :  { %v153_v33 = vpop.f32.mrf.mxu0 }
 0x15e   :  { %162 = vst [vmem:[#allocation5] sm:$0xff] %v153_v33 }
 0x15f   :  { %251 = shalt.err (!%p248_p9)
}
 0x160   :  { %175 = dma.vmem_to_hbm [thread:$0]  %s170_s1, 256, %s307_s2, [#allocation4], %s265_s12, %s265_s12, %s266_s13  }
 0x161   :  { %262 = dma.done.wait [#allocation4], 256  }
 0x162   :  { %263 = vsyncadd [#allocation4], 4294967040 }
 0x163   :  { %179 = vsyncpa [#allocation3], 1 }
 0x164   :  { %180 = vsyncpa [#allocation4], 1 }

</bundles_post_ra>
